<compile_context>
chip_gen: v7x
topology: tpu7x:2x2x1
jax: 0.10.0
libtpu: 0.0.40
codegen_flags: <defaults>
</compile_context>

<pallas_src>
import functools

import jax
import jax.numpy as jnp
import numpy as np
from jax import lax
from jax.experimental import pallas as pl
from jax.experimental.pallas import tpu as pltpu


def _round_up(x, m):
    return (x + m - 1) // m * m


def _mask_attn_kernel(C2, NQ, ATT_OFF,
                      regimes_ref,          # SMEM (B,) int32  -- scalar prefetch
                      x_ref,                # (P, hidden)      pixel-major, native NHWC flatten
                      wab_ref, bab_ref,     # (C2R, hidden), (C2R, 1)  fused a_conv + att_conv
                      wlin_ref, blin_ref,   # (A, C2, P), (1, A)       regime-selected actor head
                      out_ref):             # (1, A)
    r = regimes_ref[pl.program_id(0)]                                   # this sample's regime

    # Fused 1x1 convs: one MXU matmul, contracting hidden against hidden
    # (trans_b form -> no activation transpose anywhere).
    full = lax.dot_general(
        wab_ref[...], x_ref[...],
        dimension_numbers=(((1,), (1,)), ((), ())),
        preferred_element_type=jnp.float32) + bab_ref[...]              # (C2R, P)

    # a_x = relu(a_conv(x))
    a_x = jnp.maximum(full[:C2, :], 0.0)                                # (C2, P)

    # att_p = sigmoid(att_conv(x)[:, regime]); all NQ logit rows live at
    # sublanes [ATT_OFF, ATT_OFF+NQ) -> pick the regime row with a one-hot matvec.
    att_rows = full[ATT_OFF:ATT_OFF + NQ, :]                            # (NQ, P)
    onehot = (lax.broadcasted_iota(jnp.int32, (1, NQ), 1) == r).astype(jnp.float32)
    att_feat = jnp.dot(onehot, att_rows,
                       preferred_element_type=jnp.float32)              # (1, P)
    att_p = jax.nn.sigmoid(att_feat)
    # (att_p_sig5 is only stored as a module attribute in the reference code
    #  and never affects the returned actions, so it is not computed here.)

    # mask attention: broadcast att_p over the channel (sublane) axis
    a_mask = a_x * att_p                                                # (C2, P)

    # actor_linear[regime]:  out[a] = tanh( sum_{c,p} a_mask[c,p] * W[a,c,p] + b[a] )
    prod = a_mask[None, :, :] * wlin_ref[...]                           # (A, C2, P)
    red_ac = jnp.sum(prod, axis=2)                                      # (A, C2)  lane reduce
    # collapse C2 and transpose to a lane-dense (1, A) row in one tiny MXU dot
    red = lax.dot_general(
        jnp.ones((1, C2), jnp.float32), red_ac,
        dimension_numbers=(((1,), (1,)), ((), ())),
        preferred_element_type=jnp.float32)                             # (1, A)
    out_ref[...] = jnp.tanh(red + blin_ref[...])


def prepare_params(params, h, w):
    """Static, one-time weight repacking (done offline / outside the hot path)."""
    C2, hidden = params["w_a"].shape
    NQ = params["w_att"].shape[0]
    num_agents, A, _ = params["w_actor"].shape
    P = h * w
    att_off = _round_up(C2, 8)
    C2R = _round_up(att_off + NQ, 8)

    # Fused conv weight/bias: rows [0:C2] = a_conv, rows [att_off:att_off+NQ] = att_conv.
    wab = jnp.zeros((C2R, hidden), jnp.float32)
    wab = wab.at[:C2].set(params["w_a"])
    wab = wab.at[att_off:att_off + NQ].set(params["w_att"])
    bab = jnp.zeros((C2R,), jnp.float32)
    bab = bab.at[:C2].set(params["b_a"])
    bab = bab.at[att_off:att_off + NQ].set(params["b_att"])
    bab = bab.reshape(C2R, 1)

    # Torch flattens a_x (B, C2, w, h) as index = c*(w*h) + wi*h + hi.  The kernel
    # uses the native NHWC flatten p = hi*w + wi, so permute the actor weights'
    # pixel axis once here instead of transposing activations at runtime.
    wlin = params["w_actor"].reshape(num_agents, A, C2, w, h)
    wlin = jnp.transpose(wlin, (0, 1, 2, 4, 3)).reshape(num_agents, A, C2, P)
    blin = params["b_actor"].reshape(num_agents, 1, A)

    return {
        "wab": wab, "bab": bab, "wlin": wlin, "blin": blin,
        "dims": {"C2": C2, "NQ": NQ, "A": A, "att_off": att_off,
                 "C2R": C2R, "P": P, "hidden": hidden},
    }


def mask_attention_agents_forward(x, c, prep):
    """x: (B, h, w, hidden) f32, c: (B, num_queries) -> (actions (B, num_actions), None)."""
    B, h, w, hidden = x.shape
    d = prep["dims"]
    C2, NQ, A = d["C2"], d["NQ"], d["A"]
    att_off, C2R, P = d["att_off"], d["C2R"], d["P"]
    assert P == h * w and hidden == d["hidden"]

    # per-sample regime = argmax(c[b]); fed to the kernel via scalar prefetch (SMEM)
    regimes = jnp.argmax(c.reshape(B, -1), axis=1).astype(jnp.int32)    # (B,)
    # free view of NHWC input: p = hi*w + wi (no transpose op)
    x_pm = x.reshape(B, P, hidden)

    kernel = functools.partial(_mask_attn_kernel, C2, NQ, att_off)

    grid_spec = pltpu.PrefetchScalarGridSpec(
        num_scalar_prefetch=1,
        grid=(B,),
        in_specs=[
            pl.BlockSpec((None, P, hidden), lambda b, r: (b, 0, 0)),        # x[b]
            pl.BlockSpec((C2R, hidden),     lambda b, r: (0, 0)),           # fused conv W (VMEM-resident)
            pl.BlockSpec((C2R, 1),          lambda b, r: (0, 0)),           # fused conv b (VMEM-resident)
            pl.BlockSpec((None, A, C2, P),  lambda b, r: (r[b], 0, 0, 0)),  # actor W[regime[b]]
            pl.BlockSpec((None, 1, A),      lambda b, r: (r[b], 0, 0)),     # actor b[regime[b]]
        ],
        out_specs=pl.BlockSpec((None, 1, A), lambda b, r: (b, 0, 0)),
    )

    out = pl.pallas_call(
        kernel,
        out_shape=jax.ShapeDtypeStruct((B, 1, A), jnp.float32),
        grid_spec=grid_spec,
        compiler_params=pltpu.CompilerParams(
            dimension_semantics=("parallel",)),
    )(regimes, x_pm, prep["wab"], prep["bab"], prep["wlin"], prep["blin"])

    actions = out.reshape(B, A)                                          # matches torch (B, num_actions)
    # TODO(synk): limit_attention / RBFMask branch not implemented (RBFMask is
    # not defined in the reference snippet); limit_attention is assumed False.
    return actions, None


def reference_forward(x, c, params):
    """Pure-JAX replica of the PyTorch forward (limit_attention=False), batched over B."""
    B = x.shape[0]
    xt = jnp.transpose(x, (0, 3, 2, 1))                                  # (B, hidden, w, h)
    regimes = jnp.argmax(c.reshape(B, -1), axis=1)                       # (B,)
    a_x = jax.nn.relu(
        jnp.einsum("bcwh,oc->bowh", xt, params["w_a"])
        + params["b_a"][None, :, None, None])                            # (B, C2, w, h)
    att_all = (jnp.einsum("bcwh,oc->bowh", xt, params["w_att"])
               + params["b_att"][None, :, None, None])                   # (B, NQ, w, h)
    att = jnp.take_along_axis(att_all, regimes[:, None, None, None], axis=1)[:, 0]
    att_p = jax.nn.sigmoid(att)                                          # (B, w, h)
    a_mask = a_x * att_p[:, None]                                        # (B, C2, w, h)
    flat = a_mask.reshape(B, -1)                                         # (B, C2*w*h)
    W = params["w_actor"][regimes]                                       # (B, A, C2*w*h)
    b = params["b_actor"][regimes]                                       # (B, A)
    return jnp.tanh(jnp.einsum("bk,bak->ba", flat, W) + b)               # (B, A)


if __name__ == "__main__":
    key = jax.random.PRNGKey(0)
    B, H, W, HID = 4, 12, 12, 32           # (hidden//2)*w*h == hidden*12*6 constraint satisfied
    NUM_ACTIONS, NUM_AGENTS = 5, 3         # num_queries_per_agent = 1 -> num_queries = num_agents
    C2, P = HID // 2, W * H

    ks = jax.random.split(key, 8)
    x = jax.random.normal(ks[0], (B, H, W, HID), jnp.float32)
    c = jax.random.normal(ks[1], (B, NUM_AGENTS), jnp.float32)

    params = {
        "w_a": 0.1 * jax.random.normal(ks[2], (C2, HID), jnp.float32),
        "b_a": 0.1 * jax.random.normal(ks[3], (C2,), jnp.float32),
        "w_att": 0.1 * jax.random.normal(ks[4], (NUM_AGENTS, HID), jnp.float32),
        "b_att": 0.1 * jax.random.normal(ks[5], (NUM_AGENTS,), jnp.float32),
        "w_actor": 0.01 * jax.random.normal(ks[6], (NUM_AGENTS, NUM_ACTIONS, C2 * P), jnp.float32),
        "b_actor": 0.01 * jax.random.normal(ks[7], (NUM_AGENTS, NUM_ACTIONS), jnp.float32),
    }

    prep = prepare_params(params, H, W)
    actions, _ = mask_attention_agents_forward(x, c, prep)
    actions = jax.block_until_ready(actions)

    ref = reference_forward(x, c, params)
    assert actions.shape == (B, NUM_ACTIONS)
    np.testing.assert_allclose(np.asarray(actions), np.asarray(ref), atol=2e-2, rtol=2e-2)
    print("KERNEL_OK")
</pallas_src>

<mosaic_0001>
module attributes {stable_mosaic.version = 11 : i64} {
  func.func @_mask_attn_kernel(%arg0: i32, %arg1: memref<4xi32, #tpu.memory_space<smem>>, %arg2: memref<1x144x32xf32, #tpu.memory_space<vmem>>, %arg3: memref<24x32xf32, #tpu.memory_space<vmem>>, %arg4: memref<24x1xf32, #tpu.memory_space<vmem>>, %arg5: memref<1x5x16x144xf32, #tpu.memory_space<vmem>>, %arg6: memref<1x1x5xf32, #tpu.memory_space<vmem>>, %arg7: memref<1x1x5xf32, #tpu.memory_space<vmem>>) attributes {dimension_semantics = [#tpu.dimension_semantics<parallel>], iteration_bounds = array<i64: 4>, scalar_prefetch = 1 : i64, scratch_operands = 0 : i64, tpu.core_type = #tpu.core_type<tc>, window_params = [{transform_indices = @transform_0, window_bounds = array<i64: 1, 144, 32>}, {pipeline_mode = #tpu.pipeline_mode<synchronous>, transform_indices = @transform_1, window_bounds = array<i64: 24, 32>}, {pipeline_mode = #tpu.pipeline_mode<synchronous>, transform_indices = @transform_2, window_bounds = array<i64: 24, 1>}, {transform_indices = @transform_3, window_bounds = array<i64: 1, 5, 16, 144>}, {transform_indices = @transform_4, window_bounds = array<i64: 1, 1, 5>}, {transform_indices = @transform_5, window_bounds = array<i64: 1, 1, 5>}]} {
    %0 = arith.index_cast %arg0 : i32 to index
    %1 = memref.load %arg1[%0] : memref<4xi32, #tpu.memory_space<smem>>
    %c0 = arith.constant 0 : index
    %c0_0 = arith.constant 0 : index
    %2 = vector.load %arg3[%c0, %c0_0] : memref<24x32xf32, #tpu.memory_space<vmem>>, vector<24x32xf32>
    %c0_1 = arith.constant 0 : index
    %c0_2 = arith.constant 0 : index
    %c0_3 = arith.constant 0 : index
    %3 = vector.load %arg2[%c0_1, %c0_2, %c0_3] : memref<1x144x32xf32, #tpu.memory_space<vmem>>, vector<1x144x32xf32>
    %4 = vector.shape_cast %3 : vector<1x144x32xf32> to vector<144x32xf32>
    %cst = arith.constant dense<0.000000e+00> : vector<24x144xf32>
    %5 = tpu.matmul %2, %4, %cst {dimension_numbers = #tpu.dot_dimension_numbers<[1], [1], [0], [0], [0, 0, 1, 0], [], []>} : vector<24x32xf32>, vector<144x32xf32>, vector<24x144xf32> -> vector<24x144xf32>
    %c0_4 = arith.constant 0 : index
    %c0_5 = arith.constant 0 : index
    %6 = vector.load %arg4[%c0_4, %c0_5] : memref<24x1xf32, #tpu.memory_space<vmem>>, vector<24x1xf32>
    %7 = vector.broadcast %6 : vector<24x1xf32> to vector<24x144xf32>
    %8 = arith.addf %5, %7 : vector<24x144xf32>
    %9 = vector.extract_strided_slice %8 {offsets = [0, 0], sizes = [16, 144], strides = [1, 1]} : vector<24x144xf32> to vector<16x144xf32>
    %cst_6 = arith.constant 0.000000e+00 : f32
    %10 = vector.broadcast %cst_6 : f32 to vector<16x144xf32>
    %11 = arith.maximumf %9, %10 : vector<16x144xf32>
    %12 = vector.extract_strided_slice %8 {offsets = [16, 0], sizes = [3, 144], strides = [1, 1]} : vector<24x144xf32> to vector<3x144xf32>
    %13 = tpu.iota {dimensions = array<i32: 1>} : vector<1x3xi32>
    %14 = vector.broadcast %1 : i32 to vector<1x3xi32>
    %15 = arith.cmpi eq, %13, %14 : vector<1x3xi32>
    %16 = arith.extui %15 : vector<1x3xi1> to vector<1x3xi32>
    %17 = arith.sitofp %16 : vector<1x3xi32> to vector<1x3xf32>
    %cst_7 = arith.constant dense<0.000000e+00> : vector<1x144xf32>
    %18 = tpu.matmul %17, %12, %cst_7 {dimension_numbers = #tpu.dot_dimension_numbers<[1], [0], [0], [1], [0, 0, 1, 1], [], []>} : vector<1x3xf32>, vector<3x144xf32>, vector<1x144xf32> -> vector<1x144xf32>
    %19 = arith.negf %18 : vector<1x144xf32>
    %20 = math.exp %19 : vector<1x144xf32>
    %cst_8 = arith.constant 1.000000e+00 : f32
    %21 = vector.broadcast %cst_8 : f32 to vector<1x144xf32>
    %22 = arith.addf %21, %20 : vector<1x144xf32>
    %23 = arith.divf %21, %22 : vector<1x144xf32>
    %24 = vector.broadcast %23 : vector<1x144xf32> to vector<16x144xf32>
    %25 = arith.mulf %11, %24 : vector<16x144xf32>
    %26 = vector.shape_cast %25 : vector<16x144xf32> to vector<1x16x144xf32>
    %c0_9 = arith.constant 0 : index
    %c0_10 = arith.constant 0 : index
    %c0_11 = arith.constant 0 : index
    %c0_12 = arith.constant 0 : index
    %27 = vector.load %arg5[%c0_9, %c0_10, %c0_11, %c0_12] : memref<1x5x16x144xf32, #tpu.memory_space<vmem>>, vector<1x5x16x144xf32>
    %28 = vector.shape_cast %27 : vector<1x5x16x144xf32> to vector<5x16x144xf32>
    %29 = vector.broadcast %26 : vector<1x16x144xf32> to vector<5x16x144xf32>
    %30 = arith.mulf %29, %28 : vector<5x16x144xf32>
    %cst_13 = arith.constant dense<0.000000e+00> : vector<5x16xf32>
    %31 = vector.multi_reduction <add>, %30, %cst_13 [2] : vector<5x16x144xf32> to vector<5x16xf32>
    %cst_14 = arith.constant 1.000000e+00 : f32
    %32 = vector.broadcast %cst_14 : f32 to vector<1x16xf32>
    %cst_15 = arith.constant dense<0.000000e+00> : vector<1x5xf32>
    %33 = tpu.matmul %32, %31, %cst_15 {dimension_numbers = #tpu.dot_dimension_numbers<[1], [1], [0], [0], [0, 0, 1, 0], [], []>} : vector<1x16xf32>, vector<5x16xf32>, vector<1x5xf32> -> vector<1x5xf32>
    %c0_16 = arith.constant 0 : index
    %c0_17 = arith.constant 0 : index
    %c0_18 = arith.constant 0 : index
    %34 = vector.load %arg6[%c0_16, %c0_17, %c0_18] : memref<1x1x5xf32, #tpu.memory_space<vmem>>, vector<1x1x5xf32>
    %35 = vector.shape_cast %34 : vector<1x1x5xf32> to vector<1x5xf32>
    %36 = arith.addf %33, %35 : vector<1x5xf32>
    %37 = math.tanh %36 : vector<1x5xf32>
    %c0_19 = arith.constant 0 : index
    %c0_20 = arith.constant 0 : index
    %c0_21 = arith.constant 0 : index
    %38 = vector.load %arg7[%c0_19, %c0_20, %c0_21] : memref<1x1x5xf32, #tpu.memory_space<vmem>>, vector<1x1x5xf32>
    %39 = vector.shape_cast %38 : vector<1x1x5xf32> to vector<1x5xf32>
    %40 = vector.shape_cast %37 : vector<1x5xf32> to vector<1x1x5xf32>
    tpu.vector_store %arg7[%c0_19, %c0_20, %c0_21], %40 {strides = array<i32>} : memref<1x1x5xf32, #tpu.memory_space<vmem>>, vector<1x1x5xf32>,
    return
  }
  func.func @transform_0(%arg0: i32, %arg1: memref<4xi32, #tpu.memory_space<smem>>) -> (i32, i32, i32) {
    %c0_i32 = arith.constant 0 : i32
    %c0_i32_0 = arith.constant 0 : i32
    %c0_i32_1 = arith.constant 0 : i32
    return %arg0, %c0_i32, %c0_i32_0 : i32, i32, i32
  }
  func.func @transform_1(%arg0: i32, %arg1: memref<4xi32, #tpu.memory_space<smem>>) -> (i32, i32) {
    %c0_i32 = arith.constant 0 : i32
    %c0_i32_0 = arith.constant 0 : i32
    %c0_i32_1 = arith.constant 0 : i32
    return %c0_i32, %c0_i32_0 : i32, i32
  }
  func.func @transform_2(%arg0: i32, %arg1: memref<4xi32, #tpu.memory_space<smem>>) -> (i32, i32) {
    %c0_i32 = arith.constant 0 : i32
    %c0_i32_0 = arith.constant 0 : i32
    %c0_i32_1 = arith.constant 0 : i32
    return %c0_i32, %c0_i32_0 : i32, i32
  }
  func.func @transform_3(%arg0: i32, %arg1: memref<4xi32, #tpu.memory_space<smem>>) -> (i32, i32, i32, i32) {
    %0 = arith.index_cast %arg0 : i32 to index
    %1 = memref.load %arg1[%0] : memref<4xi32, #tpu.memory_space<smem>>
    %c0_i32 = arith.constant 0 : i32
    %c0_i32_0 = arith.constant 0 : i32
    %c0_i32_1 = arith.constant 0 : i32
    %c0_i32_2 = arith.constant 0 : i32
    return %1, %c0_i32, %c0_i32_0, %c0_i32_1 : i32, i32, i32, i32
  }
  func.func @transform_4(%arg0: i32, %arg1: memref<4xi32, #tpu.memory_space<smem>>) -> (i32, i32, i32) {
    %0 = arith.index_cast %arg0 : i32 to index
    %1 = memref.load %arg1[%0] : memref<4xi32, #tpu.memory_space<smem>>
    %c0_i32 = arith.constant 0 : i32
    %c0_i32_0 = arith.constant 0 : i32
    %c0_i32_1 = arith.constant 0 : i32
    return %1, %c0_i32, %c0_i32_0 : i32, i32, i32
  }
  func.func @transform_5(%arg0: i32, %arg1: memref<4xi32, #tpu.memory_space<smem>>) -> (i32, i32, i32) {
    %c0_i32 = arith.constant 0 : i32
    %c0_i32_0 = arith.constant 0 : i32
    %c0_i32_1 = arith.constant 0 : i32
    return %arg0, %c0_i32, %c0_i32_0 : i32, i32, i32
  }
}

</mosaic_0001>

<bundles_post_ra>
// kernel: tpu_custom_call.1
= control target key start
LH: loop header
LB: loop body
LE: loop exit
PB: predicated region body
PF: predicated region fallthrough
CT: control target
= control target key end

     0   :  { %s1387_s0 = inlined_call_operand.vmem [shape: s32[4], index: 0, kind: input, shape index: {}]   ;;  %s1388_s1 = inlined_call_operand.vmem [shape: f32[4,144,32], index: 1, kind: input, shape index: {}]   ;;  %s1389_s2 = inlined_call_operand.vmem [shape: f32[24,32], index: 2, kind: input, shape index: {}]   ;;  %s1390_s3 = inlined_call_operand.vmem [shape: f32[24,1], index: 3, kind: input, shape index: {}]   ;;  %s1391_s4 = inlined_call_operand.vmem [shape: f32[3,5,16,144], index: 4, kind: input, shape index: {}]   ;;  %s1392_s5 = inlined_call_operand.vmem [shape: f32[3,1,5], index: 5, kind: input, shape index: {}]   ;;  %s1393_s6 = inlined_call_operand.hbm [shape: f32[4,1,5], index: 6, kind: output, shape index: {}]  }
   0x1   :  { %s11_s23 = sshll.u32 %s1387_s0, 4  ;;  %s12_s23 = int_to_ptr.vmem [resolvable:$true] %s11_s23 }
   0x2   :  { %s1034_s24 = scalar_lea.vmem %s12_s23, 16  ;;  %p1039_p1 = scmp.lt.s32.totalorder %s12_s23, %s12_s23 }
   0x3   :  { %p1035_p0 = scmp.ne.s32.totalorder %s12_s23, %s1034_s24  ;;  %p1040_p2 = scmp.lt.s32.totalorder %s1034_s24, %s1034_s24 }
   0x5   :  { %p1041_p3 = por %p1040_p2, %p1039_p1 }
   0x7   :  { %p1042_p4 = pnand %p1041_p3, %p1035_p0 }
   0x9   :  { %1045 = shalt.err (!%p1042_p4)  }
   0xa   :  { %s1112_s25 = smov [#allocation3]  }
   0xb   :  { %14 = dma.vmem_to_smem %s12_s23, 16, %s1112_s25, [#allocation2] }
   0xc   :  { %1090 = dma.done.wait [#allocation2], 16 }
   0xd   :  { %1091 = vsyncadd [#allocation2], 4294967280 }
   0xe   :  { %16 = sfence }
   0xf   :  { %17 = vsyncpa [#allocation5], 0 }
  0x10   :  { %19 = vsyncpa [#allocation5 + $0x1], 0  ;;  %s1157_s26 = smov 0   ;;  %s1159_s27 = smov 0  }
  0x11   :  { %s1161_s0 = smov 0   ;;  %s1163_s28 = smov 0  }
  0x12 LB: > { %s1178_s29 = sadd.s32 4294967295, %s1110_s28   ;;  %s894_s30 = sadd.s32 4294967294, %s1110_s28   ;;  %s1110_s28 = sphi %s1163_s28, %s1401_s28   ;;  %s1106_s0 = sphi %s1161_s0, %s1400_s0   ;;  %s1102_s27 = sphi %s1159_s27, %s1399_s27   ;;  %s1098_s26 = sphi %s1157_s26, %s1398_s26  }
  0x13   : > { %s1182_s7 = sadd.s32 1, %s1110_s28   ;;  %s156_s8 = sadd.s32 1, %s1106_s0 }
  0x14   : > { %s153_s9 = ssub.s32 %s1110_s28, %s1182_s7  ;;  %p166_p5 = scmp.ne.s32.totalorder %s1106_s0, %s1102_s27 }
  0x15   : > { %p154_p6 = scmp.eq.s32.totalorder %s153_s9, 0  ;;  %p167_p7 = scmp.eq.s32.totalorder %s1178_s29, 3 }
  0x16   : > { %p172_p8 = scmp.ne.s32.totalorder %s1102_s27, %s1098_s26  ;;  %p173_p9 = scmp.eq.s32.totalorder %s894_s30, 3 }
  0x17   : > { %s1193_s10 = scalar_select %p154_p6, %s1106_s0, %s156_s8  }
  0x18   : > { %p1195_p10 = por %p167_p7, %p166_p5  ;;  %p1199_p11 = por %p173_p9, %p172_p8 }
  0x19   : > { %p897_p12 = scmp.ge.s32.totalorder %s1110_s28, 1  ;;  %p223_p13 = scmp.lt.s32.totalorder %s1110_s28, 5 }
  0x1b   : > { %p224_p0 = pnand %p897_p12, %p223_p13 }
  0x1c   : > { %p260_p1 = scmp.lt.s32.totalorder (!%p224_p0), %s1178_s29, 3  ;;  %v1113_v0 = vmov (!%p224_p0), 0.0|0.0   ;;  %v1114_v1 = vmov (!%p224_p0), 0.0   ;;  %v301_v2 = vld [vmem:[%s1390_s3 + $0x10] sm:$0xff] (!%p224_p0)  ;;  %v1115_v3 = vmov (!%p224_p0), 0   ;;  %v300_v4 = vld [vmem:[%s1390_s3 + $0x8] sm:$0xff] (!%p224_p0)  ;;  %v468_v38 = vlaneseq (!%p224_p0) }
  0x1d   : > { %227 = sbr.rel (%p224_p0) target bundleno = 992 (0x3e0), region = 40  ;;  %939 = vmatprep.subr.bf16.mxu0 (!%p224_p0), %v1113_v0  ;;  %445 = vmatprep.mubr.f32.mxu0 (!%p224_p0), %v1114_v1  ;;  %vm317_vm0 = vcmask (!%p224_p0), 261120   ;;  %v299_v5 = vld [vmem:[%s1390_s3] sm:$0xff] (!%p224_p0)  ;;  %v279_v35 = vld [vmem:[%s1389_s2 + $0x8] sm:$0xff] (!%p224_p0)  ;;  %v280_v36 = vld [vmem:[%s1389_s2 + $0x10] sm:$0xff] (!%p224_p0)  ;;  %s277_s14 = sld [smem:[#allocation3 + %s1178_s29]] (!%p224_p0) }
  0x1e   : > { %1022 = vset.pattern.permute.xlu0 (!%p224_p0), %v1115_v3  ;;  %1023 = vset.pattern.permute.xlu1 (!%p224_p0), %v1115_v3  ;;  %vm1227_vm1 = vmpackc.low (!%p224_p0), %vm317_vm0, %vm317_vm0  ;;  %v278_v34 = vld [vmem:[%s1389_s2] sm:$0xff] (!%p224_p0)  ;;  %v1280_v41 = vand.u32 (!%p224_p0), 127, %v468_v38  ;;  %vm478_vm3 = vcmask (!%p224_p0), 1042432   ;;  %vm474_vm4 = vcmask (!%p224_p0), 23552   ;;  %v1286_v58 = vshrl.u32 (!%p224_p0), %v468_v38, 7  ;;  %s272_s20 = sld [smem:[#allocation3 + %s1178_s29]] (!%p224_p0) }
  0x1f   : > { %314 = vperm.xlu0 (!%p224_p0), %1022, %v301_v2   ;;  %309 = vperm.xlu1 (!%p224_p0), %1023, %v300_v4   ;;  %vm620_vm5 = vcmask (!%p224_p0), 130048   ;;  %vm1116_vm6 = vmmov (!%p224_p0), 0   ;;  %vm681_vm7 = vcmask (!%p224_p0), 130112   ;;  %vm719_vm8 = vcmask (!%p224_p0), 1041409   ;;  %s258_s24 = sand.u32 (!%p224_p0), 1, %s1102_s27   ;;  %s929_s25 = sshll.u32 (!%p224_p0), %s1178_s29, 4 }
  0x20   : > { %549 = vmatprep.mubr.f32.mxu1 (!%p224_p0), %v1114_v1  ;;  %v570_v63 = vsub.s32 (!%p224_p0), 0, %v1286_v58  ;;  %vm721_vm9 = vcmask (!%p224_p0), 1042434   ;;  %vm723_vm10 = vcmask (!%p224_p0), 1043459   ;;  %vm725_vm11 = vcmask (!%p224_p0), 1044484   ;;  %s259_s30 = scalar_lea.vmem (!%p224_p0), [#allocation4], %s258_s24 }
  0x21   : > { %s818_s8 = sshll.u32 (!%p224_p0), %s259_s30, 4  ;;  %vm803_vm12 = vcmask (!%p224_p0), 32768   ;;  %s1347_s8 = int_to_ptr.vmem [resolvable:$true] %s818_s8 }
  0x23   : > { %304 = vperm.xlu0 (!%p224_p0), %1022, %v299_v5   ;;  %v470_v43 = vstv (!%p224_p0), %s277_s14  ;;  %s1345_s14 = scalar_lea.hbm (!%p224_p0), %s1393_s6, %s929_s25 }
  0x24   : > { %s261_s15 = scalar_select %p260_p1, %s1178_s29, 3  ;;  %vm471_vm2 = vcmp.eq.s32.totalorder %v1280_v41, %v470_v43 }
  0x25   : > { %v921_v49 = vsel %vm471_vm2, 1.0, %v1114_v1  ;;  %p273_p3 = scmp.lt.s32.totalorder %s272_s20, 2 }
  0x26   : > { %s975_s18 = smul.u32 144, %s261_s15  ;;  %s265_s15 = sld [smem:[#allocation3 + %s1178_s29]] }
  0x27   : > { %s1405_s20 = smov (!%p273_p3, %s272_s20), 2  ;;  %s1118_s29 = smov [#allocation4]  }
  0x28   : > { %s1221_s23 = scalar_lea.vmem %s1388_s1, %s975_s18  ;;  %s1050_s17 = sshll.u32 %s1118_s29, 4  ;;  %s1051_s17 = int_to_ptr.vmem [resolvable:$false] %s1050_s17 }
  0x29   : > { %v281_v6 = vld [vmem:[%s1221_s23] sm:$0xff]  ;;  %v282_v7 = vld [vmem:[%s1221_s23 + $0x8] sm:$0xff]  ;;  %v283_v10 = vld [vmem:[%s1221_s23 + $0x10] sm:$0xff]  ;;  %s1052_s18 = scalar_lea.vmem %s1051_s17, 32  ;;  %p1053_p7 = scmp.lt.s32.totalorder %s1347_s8, %s1051_s17 }
  0x2a   : > { %v940_v9 = vpack.c.bf16 %v282_v7, %v281_v6  ;;  %v284_v11 = vld [vmem:[%s1221_s23 + $0x18] sm:$0xff]  ;;  %v285_v13 = vld [vmem:[%s1221_s23 + $0x20] sm:$0xff]  ;;  %v286_v14 = vld [vmem:[%s1221_s23 + $0x28] sm:$0xff] }
  0x2b   : > { %v944_v12 = vpack.c.bf16 %v284_v11, %v283_v10  ;;  %v948_v15 = vpack.c.bf16 %v286_v14, %v285_v13  ;;  %v287_v16 = vld [vmem:[%s1221_s23 + $0x30] sm:$0xff]  ;;  %v288_v17 = vld [vmem:[%s1221_s23 + $0x38] sm:$0xff]  ;;  %v289_v19 = vld [vmem:[%s1221_s23 + $0x40] sm:$0xff] }
  0x2c   : > { %942 = vmatpush1.bf16.xpose.msk.msra.mxu0 %vm1227_vm1, %v940_v9  ;;  %v952_v18 = vpack.c.bf16 %v288_v17, %v287_v16  ;;  %v290_v20 = vld [vmem:[%s1221_s23 + $0x48] sm:$0xff]  ;;  %v291_v22 = vld [vmem:[%s1221_s23 + $0x50] sm:$0xff]  ;;  %v292_v23 = vld [vmem:[%s1221_s23 + $0x58] sm:$0xff]  ;;  %p266_p2 = scmp.lt.s32.totalorder %s265_s15, 2 }
  0x2d   : > { %943 = vmatprep.subr.bf16.mxu0 %v1113_v0  ;;  %v956_v21 = vpack.c.bf16 %v290_v20, %v289_v19  ;;  %v960_v24 = vpack.c.bf16 %v292_v23, %v291_v22  ;;  %v293_v25 = vld [vmem:[%s1221_s23 + $0x60] sm:$0xff]  ;;  %v294_v26 = vld [vmem:[%s1221_s23 + $0x68] sm:$0xff]  ;;  %v295_v28 = vld [vmem:[%s1221_s23 + $0x70] sm:$0xff] }
  0x2e   : > { %v964_v27 = vpack.c.bf16 %v294_v26, %v293_v25  ;;  %v296_v29 = vld [vmem:[%s1221_s23 + $0x78] sm:$0xff]  ;;  %v297_v31 = vld [vmem:[%s1221_s23 + $0x80] sm:$0xff]  ;;  %v298_v32 = vld [vmem:[%s1221_s23 + $0x88] sm:$0xff]  ;;  %s1403_s15 = smov (!%p266_p2, %s265_s15), 2  ;;  %s275_s23 = scalar_lea.vmem %s1392_s5, %s1405_s20 }
  0x2f   : > { %v968_v30 = vpack.c.bf16 %v296_v29, %v295_v28  ;;  %v972_v33 = vpack.c.bf16 %v298_v32, %v297_v31  ;;  %s976_s16 = smul.u32 160, %s1403_s15  ;;  %s806_s15 = scalar_lea.sflag [#allocation5], %s258_s24 }
  0x31   : > { %s1292_s19 = scalar_lea.vmem %s1391_s4, %s976_s16  ;;  %s1046_s16 = scalar_lea.vmem %s1347_s8, 16 }
  0x32   : > { %v582_v8 = vld [vmem:[%s1292_s19 + $0x10] sm:$0xff]  ;;  %v583_v9 = vld [vmem:[%s1292_s19 + $0x18] sm:$0xff]  ;;  %v580_v10 = vld [vmem:[%s1292_s19] sm:$0xff]  ;;  %p1047_p4 = scmp.ne.s32.totalorder %s1347_s8, %s1046_s16  ;;  %p1054_p8 = scmp.lt.s32.totalorder %s1052_s18, %s1046_s16 }
  0x33   : > { %v581_v14 = vld [vmem:[%s1292_s19 + $0x8] sm:$0xff]  ;;  %v586_v16 = vld [vmem:[%s1292_s19 + $0x30] sm:$0xff]  ;;  %v587_v20 = vld [vmem:[%s1292_s19 + $0x38] sm:$0xff] }
  0x34   : > { %946 = vmatpush1.bf16.xpose.msk.msra.mxu0 %vm1227_vm1, %v944_v12  ;;  %v585_v19 = vld [vmem:[%s1292_s19 + $0x28] sm:$0xff]  ;;  %v590_v25 = vld [vmem:[%s1292_s19 + $0x50] sm:$0xff]  ;;  %v591_v26 = vld [vmem:[%s1292_s19 + $0x58] sm:$0xff]  ;;  %p1048_p5 = pnand %p1047_p4, %p1195_p10  ;;  %p1055_p9 = por %p1054_p8, %p1053_p7 }
  0x35   : > { %947 = vmatprep.subr.bf16.mxu0 %v1113_v0 }
  0x36   : > { %p1049_p6 = pneg %p1048_p5 }
  0x38   : > { %p1056_p12 = pnand %p1055_p9, %p1049_p6 }
  0x3c   : > { %950 = vmatpush1.bf16.xpose.msk.msra.mxu0 %vm1227_vm1, %v948_v15  ;;  %v584_v15 = vld [vmem:[%s1292_s19 + $0x20] sm:$0xff] }
  0x3d   : > { %951 = vmatprep.subr.bf16.mxu0 %v1113_v0 }
  0x44   : > { %954 = vmatpush1.bf16.xpose.msk.msra.mxu0 %vm1227_vm1, %v952_v18 }
  0x45   : > { %955 = vmatprep.subr.bf16.mxu0 %v1113_v0 }
  0x4c   : > { %958 = vmatpush1.bf16.xpose.msk.msra.mxu0 %vm1227_vm1, %v956_v21  ;;  %v588_v21 = vld [vmem:[%s1292_s19 + $0x40] sm:$0xff] }
  0x4d   : > { %959 = vmatprep.subr.bf16.mxu0 %v1113_v0 }
  0x54   : > { %962 = vmatpush1.bf16.xpose.msk.msra.mxu0 %vm1227_vm1, %v960_v24  ;;  %v589_v24 = vld [vmem:[%s1292_s19 + $0x48] sm:$0xff] }
  0x55   : > { %963 = vmatprep.subr.bf16.mxu0 %v1113_v0 }
  0x5c   : > { %966 = vmatpush1.bf16.xpose.msk.msra.mxu0 %vm1227_vm1, %v964_v27 }
  0x5d   : > { %967 = vmatprep.subr.bf16.mxu0 %v1113_v0 }
  0x64   : > { %970 = vmatpush1.bf16.xpose.msk.msra.mxu0 %vm1227_vm1, %v968_v30 }
  0x65   : > { %971 = vmatprep.subr.bf16.mxu0 %v1113_v0 }
  0x6c   : > { %974 = vmatpush1.bf16.xpose.msk.msra.mxu0 %vm1227_vm1, %v972_v33 }
  0x73   : > { %918 = vmatmul.mubr.msk.f32.vlgmr.msra.gmra.mrb[0].mxu0 %vm317_vm0, %v278_v34 }
  0x74   : > { %451 = vmatprep.mubr.f32.mxu0 %v1114_v1 }
  0x77   : > { %919 = vmatmul.mubr.msk.f32.gmra.mrb[2].mxu0 %vm317_vm0, %v279_v35 }
  0x78   : > { %457 = vmatprep.mubr.f32.mxu0 %v1114_v1 }
  0x7b   : > { %920 = vmatmul.mubr.msk.f32.gmra.mrb[4].mxu0 %vm317_vm0, %v280_v36 }
  0x9e   : > { %v315_v45 = vpop.permute.xlu0 %314  ;;  %v310_v60 = vpop.permute.xlu1 %309 }
  0xa2   : > { %v305_v59 = vpop.permute.xlu0 %304 }
 0x146   : > { %v447_v37 = vpop.f32.mrb[0].mxu0 }
 0x147   : > { %v449_v39 = vpop.f32.mrb[1].mxu0  ;;  %v448_v61 = vadd.f32 %v447_v37, %v305_v59 }
 0x148   : > { %v450_v0 = vadd.f32 %v449_v39, %v305_v59  ;;  %v593_v39 = vld [vmem:[%s1292_s19 + $0x68] sm:$0xff] }
 0x149   : > { %v464_v5 = vmax.f32 %v448_v61, 0.0 }
 0x14a   : > { %v453_v40 = vpop.f32.mrb[2].mxu0  ;;  %v465_v11 = vmax.f32 %v450_v0, 0.0 }
 0x14b   : > { %v455_v42 = vpop.f32.mrb[3].mxu0  ;;  %v454_v62 = vadd.f32 %v453_v40, %v310_v60 }
 0x14c   : > { %v456_v2 = vadd.f32 %v455_v42, %v310_v60 }
 0x14d   : > { %v466_v6 = vmax.f32 %v454_v62, 0.0  ;;  %v598_v62 = vld [vmem:[%s1292_s19 + $0x90] sm:$0xff] }
 0x14e   : > { %v459_v44 = vpop.f32.mrb[4].mxu0  ;;  %v467_v12 = vmax.f32 %v456_v2, 0.0 }
 0x14f   : > { %v461_v46 = vpop.f32.mrb[5].mxu0  ;;  %v460_v48 = vadd.f32 %v459_v44, %v315_v45 }
 0x150   : > { %v462_v47 = vadd.f32 %v461_v46, %v315_v45  ;;  %v592_v45 = vld [vmem:[%s1292_s19 + $0x60] sm:$0xff] }
 0x152   : > { %922 = vmatprep.subr.msk.mxu1 %vm478_vm3, %v462_v47 }
 0x153   : > { %923 = vmatpush1.msk.msra.mxu1 %vm478_vm3, %v460_v48 }
 0x154   : > { %924 = vmatmul.mubr.msk.f32.vlgmr.msra.gmra.mrb[0].mxu1 %vm474_vm4, %v921_v49  ;;  %934 = vmatprep.subr.mxu1 %v1114_v1 }
 0x155   : > { %936 = vmatprep.mubr.msk.f32.mxu1 %vm1116_vm6, %v1114_v1 }
 0x227   : > { %v551_v50 = vpop.f32.mrb[0].mxu1 }
 0x228   : > { %v925_v51 = vmul.f32 -1.442695, %v551_v50  ;;  %v553_v52 = vpop.f32.mrb[1].mxu1  ;;  %v595_v50 = vld [vmem:[%s1292_s19 + $0x78] sm:$0xff] }
 0x229   : > { %v926_v53 = vmul.f32 -1.442695, %v553_v52 }
 0x22a   : > { %1024 = vpow2.f32 %v925_v51  ;;  %v597_v51 = vld [vmem:[%s1292_s19 + $0x88] sm:$0xff] }
 0x22b   : > { %1026 = vpow2.f32 %v926_v53 }
 0x234   : > { %v1025_v54 = vpop.eup %1024 }
 0x235   : > { %v1027_v55 = vpop.eup %1026  ;;  %v562_v56 = vadd.f32 1.0, %v1025_v54 }
 0x236   : > { %v563_v57 = vadd.f32 1.0, %v1027_v55  ;;  %v594_v55 = vld [vmem:[%s1292_s19 + $0x70] sm:$0xff] }
 0x237   : > { %1028 = vrcp.f32 %v562_v56  ;;  %v596_v56 = vld [vmem:[%s1292_s19 + $0x80] sm:$0xff] }
 0x238   : > { %1030 = vrcp.f32 %v563_v57  ;;  %v599_v57 = vld [vmem:[%s1292_s19 + $0x98] sm:$0xff] }
 0x241   : > { %v1029_v3 = vpop.eup %1028 }
 0x242   : > { %v1031_v4 = vpop.eup %1030  ;;  %v571_v7 = vrot.slane %v1029_v3, %v570_v63 }
 0x243   : > { %v575_v13 = vrot.slane %v1031_v4, %v570_v63 }
 0x244   : > { %v578_v17 = vmul.f32 %v571_v7, %v466_v6  ;;  %v576_v18 = vmul.f32 %v571_v7, %v464_v5 }
 0x245   : > { %v579_v22 = vmul.f32 %v575_v13, %v467_v12  ;;  %v577_v23 = vmul.f32 %v575_v13, %v465_v11 }
 0x246   : > { %v602_v27 = vmul.f32 %v582_v8, %v578_v17  ;;  %v600_v28 = vmul.f32 %v580_v10, %v576_v18  ;;  %v604_v29 = vmul.f32 %v584_v15, %v576_v18  ;;  %v606_v30 = vmul.f32 %v586_v16, %v578_v17 }
 0x247   : > { %v603_v31 = vmul.f32 %v583_v9, %v579_v22  ;;  %v601_v32 = vmul.f32 %v581_v14, %v577_v23  ;;  %v605_v33 = vmul.f32 %v585_v19, %v577_v23  ;;  %v607_v34 = vmul.f32 %v587_v20, %v579_v22 }
 0x248   : > { %v608_v35 = vmul.f32 %v588_v21, %v576_v18  ;;  %v609_v36 = vmul.f32 %v589_v24, %v577_v23  ;;  %v610_v37 = vmul.f32 %v590_v25, %v578_v17  ;;  %v611_v38 = vmul.f32 %v591_v26, %v579_v22 }
 0x249   : > { %v625_v40 = vsel %vm620_vm5, %v603_v31, 0.0  ;;  %v621_v42 = vsel %vm620_vm5, %v601_v32, 0.0  ;;  %v629_v43 = vsel %vm620_vm5, %v605_v33, 0.0  ;;  %v633_v44 = vsel %vm620_vm5, %v607_v34, 0.0 }
 0x24a   : > { %v626_v46 = vadd.f32 %v625_v40, %v602_v27  ;;  %v622_v47 = vadd.f32 %v621_v42, %v600_v28  ;;  %v630_v48 = vadd.f32 %v629_v43, %v604_v29  ;;  %v634_v49 = vadd.f32 %v633_v44, %v606_v30 }
 0x24b   : > { %v637_v52 = vsel %vm620_vm5, %v609_v36, 0.0  ;;  %v641_v53 = vsel %vm620_vm5, %v611_v38, 0.0  ;;  %v613_v54 = vmul.f32 %v593_v39, %v577_v23  ;;  %v612_v61 = vmul.f32 %v592_v45, %v576_v18  ;;  %v661_v45 = vld [vmem:[%s275_s23] sm:$0x1] }
 0x24c   : > { %627 = vadd.xlane.f32.xlu0 %v626_v46  ;;  %623 = vadd.xlane.f32.xlu1 %v622_v47  ;;  %v638_v59 = vadd.f32 %v637_v52, %v608_v35  ;;  %v642_v60 = vadd.f32 %v641_v53, %v610_v37  ;;  %v615_v0 = vmul.f32 %v595_v50, %v579_v22  ;;  %v676_v16 = vadd.s32 4294967288, %v1280_v41 }
 0x24d   : > { %v645_v63 = vsel %vm620_vm5, %v613_v54, 0.0  ;;  %v617_v2 = vmul.f32 %v597_v51, %v577_v23  ;;  %v614_v4 = vmul.f32 %v594_v55, %v578_v17  ;;  %v616_v5 = vmul.f32 %v596_v56, %v576_v18 }
 0x24e   : > { %v646_v3 = vadd.f32 %v645_v63, %v612_v61  ;;  %v619_v6 = vmul.f32 %v599_v57, %v579_v22  ;;  %v649_v7 = vsel %vm620_vm5, %v615_v0, 0.0  ;;  %v618_v9 = vmul.f32 %v598_v62, %v578_v17 }
 0x24f   : > { %v653_v8 = vsel %vm620_vm5, %v617_v2, 0.0  ;;  %v650_v10 = vadd.f32 %v649_v7, %v614_v4  ;;  %v679_v19 = vsub.s32 %v676_v16, %v1286_v58  ;;  %v674_v20 = vsub.s32 %v1280_v41, %v1286_v58 }
 0x250   : > { %631 = vadd.xlane.f32.xlu0 %v630_v48  ;;  %635 = vadd.xlane.f32.xlu1 %v634_v49  ;;  %v654_v11 = vadd.f32 %v653_v8, %v616_v5  ;;  %v657_v12 = vsel %vm620_vm5, %v619_v6, 0.0  ;;  %v1117_v44 = vmov 1.0  }
 0x251   : > { %v658_v13 = vadd.f32 %v657_v12, %v618_v9 }
 0x254   : > { %639 = vadd.xlane.f32.xlu0 %v638_v59  ;;  %643 = vadd.xlane.f32.xlu1 %v642_v60 }
 0x258   : > { %647 = vadd.xlane.f32.xlu0 %v646_v3  ;;  %651 = vadd.xlane.f32.xlu1 %v650_v10 }
 0x25c   : > { %655 = vadd.xlane.f32.xlu0 %v654_v11  ;;  %659 = vadd.xlane.f32.xlu1 %v658_v13 }
 0x2d9   : > { %v628_v14 = vpop.xlane.xlu0 %627  ;;  %v624_v15 = vpop.xlane.xlu1 %623 }
 0x2da   : > { %v680_v27 = vrot.slane %v628_v14, %v679_v19  ;;  %v675_v28 = vrot.slane %v624_v15, %v674_v20 }
 0x2dc   : > { %v682_v41 = vsel %vm681_vm7, %v680_v27, %v675_v28 }
 0x2dd   : > { %v632_v17 = vpop.xlane.xlu0 %631  ;;  %v636_v18 = vpop.xlane.xlu1 %635 }
 0x2de   : > { %v686_v23 = vrot.slane %v632_v17, %v674_v20  ;;  %v690_v24 = vrot.slane %v636_v18, %v679_v19 }
 0x2e0   : > { %v691_v32 = vsel %vm681_vm7, %v690_v24, %v686_v23 }
 0x2e1   : > { %v640_v21 = vpop.xlane.xlu0 %639  ;;  %v644_v22 = vpop.xlane.xlu1 %643  ;;  %v720_v36 = vsel %vm719_vm8, %v691_v32, %v682_v41 }
 0x2e2   : > { %v695_v25 = vrot.slane %v640_v21, %v674_v20  ;;  %v699_v26 = vrot.slane %v644_v22, %v679_v19 }
 0x2e4   : > { %v700_v33 = vsel %vm681_vm7, %v699_v26, %v695_v25 }
 0x2e5   : > { %v648_v1 = vpop.xlane.xlu0 %647  ;;  %v652_v29 = vpop.xlane.xlu1 %651  ;;  %v722_v39 = vsel %vm721_vm9, %v700_v33, %v720_v36 }
 0x2e6   : > { %v704_v30 = vrot.slane %v648_v1, %v674_v20  ;;  %v708_v31 = vrot.slane %v652_v29, %v679_v19 }
 0x2e8   : > { %v709_v58 = vsel %vm681_vm7, %v708_v31, %v704_v30 }
 0x2e9   : > { %v656_v34 = vpop.xlane.xlu0 %655  ;;  %v660_v35 = vpop.xlane.xlu1 %659  ;;  %v724_v40 = vsel %vm723_vm10, %v709_v58, %v722_v39 }
 0x2ea   : > { %v713_v37 = vrot.slane %v656_v34, %v674_v20  ;;  %v717_v38 = vrot.slane %v660_v35, %v679_v19 }
 0x2ec   : > { %v718_v42 = vsel %vm681_vm7, %v717_v38, %v713_v37 }
 0x2ed   : > { %v726_v43 = vsel %vm725_vm11, %v718_v42, %v724_v40 }
 0x2ee   : > { %935 = vmatpush3.xpose.msk.msra.mxu1 %vm620_vm5, %v726_v43 }
 0x2f1   : > { %937 = vmatmul.mubr.msk.f32.vlgmr.msra.gmra.mrb[2].mxu1 %vm620_vm5, %v1117_v44 }
 0x3c4   : > { %v798_v46 = vpop.f32.mrb[2].mxu1 }
 0x3c5   : > { %v799_v47 = vadd.f32 %v798_v46, %v661_v45  ;;  %v938_v48 = vpop.f32.mrb[3].mxu1 }
 0x3c7   : > { %1032 = vtanh.f32 %v799_v47 }
 0x3d1   : > { %v1033_v49 = vpop.eup %1032 }
 0x3d2   : > { %804 = vst.msk [vmem:[%s259_s30] sm:$0x1] %vm803_vm12, %v1033_v49 }
 0x3d3   : > { %1059 = shalt.err (!%p1056_p12)
}
 0x3d4   : > { %s1060_s19 = scalar_lea.hbm %s1345_s14, 16  ;;  %s1064_s22 = scalar_lea.hbm %s1393_s6, 64 }
 0x3d5   : > { %p1061_p13 = scmp.ne.s32.totalorder %s1345_s14, %s1060_s19  ;;  %p1065_p2 = scmp.lt.u32.totalorder %s1345_s14, %s1393_s6 }
 0x3d6   : > { %p1066_p3 = scmp.lt.u32.totalorder %s1064_s22, %s1060_s19  ;;  %p1068_p5 = scmp.lt.u32.totalorder %s1060_s19, %s1345_s14 }
 0x3d7   : > { %p1062_p0 = pnand %p1061_p13, %p1195_p10 }
 0x3d8   : > { %p1067_p4 = por %p1066_p3, %p1065_p2 }
 0x3d9   : > { %p1063_p1 = pneg %p1062_p0 }
 0x3da   : > { %p1069_p6 = por %p1068_p5, %p1067_p4 }
 0x3dc   : > { %p1070_p7 = pnand %p1069_p6, %p1063_p1 }
 0x3de   : > { %1073 = shalt.err (!%p1070_p7)
}
 0x3df   : > { %977 = dma.vmem_to_hbm [thread:$0]  (%p1195_p10), %s1347_s8, 16, %s1345_s14, %s806_s15  }
 0x3e0 PF: > { %p983_p8 = scmp.ge.s32.totalorder %s1110_s28, 2  ;;  %s830_s25 = sand.u32 1, %s1098_s26  }
 0x3e1   : > { %s831_s30 = scalar_lea.sflag [#allocation5], %s830_s25 }
 0x3e2   : > { %p980_p9 = pnand %p983_p8, %p1199_p11 }
 0x3e4   : > { %1093 = dma.done.wait (!%p980_p9), %s831_s30, 16  }
 0x3e5   : > { %1095 = vsyncadd (!%p980_p9), %s831_s30, 4294967280  ;;  %p22_p12 = scmp.ge.s32.totalorder %s1182_s7, 6   ;;  %s1398_s26 = smov %s1102_s27 }
 0x3e6   : > { %s1399_s27 = smov %s1106_s0  ;;  %s1400_s0 = smov %s1193_s10 }
 0x3e7   : > { %s1401_s28 = smov %s1182_s7  ;;  %24 = sbr.rel (!%p22_p12) target bundleno = 18 (0x12), region = 81 }
 0x3ee   :  { %835 = vsyncpa [#allocation5], 1 }
 0x3ef   :  { %837 = vsyncpa [#allocation5 + $0x1], 1 }

</bundles_post_ra>
